<compile_context>
chip_gen: v7x
topology: tpu7x:2x2x1
jax: 0.10.0
libtpu: 0.0.40
codegen_flags: <defaults>
</compile_context>

<pallas_src>
import jax
import jax.numpy as jnp
from jax.experimental import pallas as pl
from jax.experimental.pallas import tpu as pltpu

# ----------------------------- config -----------------------------
BATCH = 2
SEQ = 8
D_MODEL = 32
NUM_HEADS = 4
D_K = D_MODEL // NUM_HEADS


# ----------------------------- kernel -----------------------------
def mha_kernel(x_ref, wqkv_ref, bqkv_ref, wo_heads_ref, bo_ref,
               out_ref, attn_ref):
    B, H, S, _ = attn_ref.shape
    BS, D = x_ref.shape
    dk = D // H

    x = x_ref[...]                                            # (B*S, D)

    # Fused Q/K/V projection: one wide MXU push (B*S, D) @ (D, 3D).
    # 1/sqrt(d_k) is already folded into the Q columns / bias (prep time).
    qkv = (jnp.dot(x, wqkv_ref[...], preferred_element_type=jnp.float32)
           + bqkv_ref[...])                                   # (B*S, 3D)
    q = qkv[:, 0 * D:1 * D]
    k = qkv[:, 1 * D:2 * D]
    v = qkv[:, 2 * D:3 * D]

    # Output accumulator stays in registers: each head is folded straight
    # through its W_o row-block, so no (B*S, D) VMEM scratch round-trip and
    # no lane-axis concatenate of head outputs.
    out_acc = jnp.zeros((BS, D), jnp.float32)

    for h in range(H):                    # static unroll; batched over B inside
        lo = h * dk
        qh = q[:, lo:lo + dk].reshape(B, S, dk)
        kh = k[:, lo:lo + dk].reshape(B, S, dk)
        vh = v[:, lo:lo + dk].reshape(B, S, dk)

        # Scores without materializing k.T (dot_general contracts last dims).
        s = jnp.einsum('bqd,bkd->bqk', qh, kh,
                       preferred_element_type=jnp.float32)    # (B, S, S)

        # Numerically-stable softmax: one exact reciprocal per row, then a
        # broadcast multiply (keeps the 1e-5 tolerance; no approx reciprocal).
        s = s - jnp.max(s, axis=-1, keepdims=True)
        e = jnp.exp(s)
        inv = 1.0 / jnp.sum(e, axis=-1, keepdims=True)        # (B, S, 1)
        w = e * inv                                           # (B, S, S)

        # Store this head's attention weights directly (no list + jnp.stack).
        attn_ref[:, h, :, :] = w

        ctx = jnp.einsum('bqk,bkd->bqd', w, vh,
                         preferred_element_type=jnp.float32)  # (B, S, dk)

        # Fold head h through its (dk, D) slice of W_o^T and accumulate:
        # out = concat_h(ctx_h) @ W_o^T  ==  sum_h ctx_h @ W_o^T[h*dk:(h+1)*dk].
        out_acc = out_acc + jnp.dot(ctx.reshape(BS, dk), wo_heads_ref[h],
                                    preferred_element_type=jnp.float32)

    out_ref[...] = out_acc + bo_ref[...]


# ----------------------------- wrappers -----------------------------
def prepare_params(params):
    """One-time (init-time) weight fusion / transposition / scale folding.

    Runs as plain XLA ops OUTSIDE the hot path; call once and reuse.
    """
    wq, bq, wk, bk, wv, bv, wo, bo = params
    D = wq.shape[0]
    H = NUM_HEADS
    dk = D // H
    scale = 1.0 / jnp.sqrt(jnp.float32(dk))

    # Fused, pre-transposed QKV weight with 1/sqrt(d_k) folded into Q.
    w_qkv_t = jnp.concatenate([wq.T * scale, wk.T, wv.T], axis=1)   # (D, 3D)
    b_qkv = jnp.concatenate([bq * scale, bk, bv]).reshape(1, 3 * D)  # (1, 3D)
    # W_o^T split into per-head row-blocks for leading-axis indexing in-kernel.
    wo_heads = wo.T.reshape(H, dk, D)                                # (H, dk, D)
    bo2 = bo.reshape(1, D)                                           # (1, D)
    return w_qkv_t, b_qkv, wo_heads, bo2


@jax.jit
def multi_head_attention(x, fused_params):
    w_qkv_t, b_qkv, wo_heads, bo2 = fused_params
    B, S, D = x.shape
    H = NUM_HEADS

    x2 = x.reshape(B * S, D)   # fused into the jitted call, not an eager dispatch

    vmem = pltpu.MemorySpace.VMEM
    out2, attn = pl.pallas_call(
        mha_kernel,
        out_shape=(
            jax.ShapeDtypeStruct((B * S, D), jnp.float32),
            jax.ShapeDtypeStruct((B, H, S, S), jnp.float32),
        ),
        # Single grid-less invocation: every operand is a whole-array VMEM block.
        in_specs=[pl.BlockSpec(memory_space=vmem)] * 5,
        out_specs=(
            pl.BlockSpec(memory_space=vmem),
            pl.BlockSpec(memory_space=vmem),
        ),
    )(x2, w_qkv_t, b_qkv, wo_heads, bo2)

    return out2.reshape(B, S, D), attn


# ----------------------------- reference -----------------------------
def mha_reference(x, params):
    wq, bq, wk, bk, wv, bv, wo, bo = params
    B, S, D = x.shape
    q = x @ wq.T + bq
    k = x @ wk.T + bk
    v = x @ wv.T + bv
    q = q.reshape(B, S, NUM_HEADS, D_K).transpose(0, 2, 1, 3)
    k = k.reshape(B, S, NUM_HEADS, D_K).transpose(0, 2, 1, 3)
    v = v.reshape(B, S, NUM_HEADS, D_K).transpose(0, 2, 1, 3)
    scores = jnp.einsum("bhqd,bhkd->bhqk", q, k) / jnp.sqrt(jnp.float32(D_K))
    attn = jax.nn.softmax(scores, axis=-1)
    out = jnp.einsum("bhqk,bhkd->bhqd", attn, v)
    out = out.transpose(0, 2, 1, 3).reshape(B, S, D)
    out = out @ wo.T + bo
    return out, attn


# ----------------------------- main -----------------------------
def init_linear(key, out_f, in_f):
    # deterministic PyTorch-like uniform(-1/sqrt(in), 1/sqrt(in)) init
    kw, kb = jax.random.split(key)
    bound = 1.0 / jnp.sqrt(jnp.float32(in_f))
    w = jax.random.uniform(kw, (out_f, in_f), jnp.float32, -bound, bound)
    b = jax.random.uniform(kb, (out_f,), jnp.float32, -bound, bound)
    return w, b


if __name__ == "__main__":
    key = jax.random.PRNGKey(0)
    kx, kq, kk, kv, ko = jax.random.split(key, 5)

    x = jax.random.normal(kx, (BATCH, SEQ, D_MODEL), jnp.float32)

    wq, bq = init_linear(kq, D_MODEL, D_MODEL)
    wk, bk = init_linear(kk, D_MODEL, D_MODEL)
    wv, bv = init_linear(kv, D_MODEL, D_MODEL)
    wo, bo = init_linear(ko, D_MODEL, D_MODEL)
    params = (wq, bq, wk, bk, wv, bv, wo, bo)

    # One-time weight fusion (init time), then a single jitted hot-path call.
    fused_params = jax.tree_util.tree_map(jax.block_until_ready,
                                          prepare_params(params))

    out, attn = multi_head_attention(x, fused_params)
    out = jax.block_until_ready(out)
    attn = jax.block_until_ready(attn)

    out_expect, attn_expect = mha_reference(x, params)
    assert out.shape == (BATCH, SEQ, D_MODEL)
    assert attn.shape == (BATCH, NUM_HEADS, SEQ, SEQ)
    assert jnp.allclose(out, out_expect, atol=1e-5, rtol=1e-5)
    assert jnp.allclose(attn, attn_expect, atol=1e-5, rtol=1e-5)

    print("KERNEL_OK")
</pallas_src>

<mosaic_0001>
module attributes {stable_mosaic.version = 11 : i64} {
  func.func @mha_kernel(%arg0: memref<16x32xf32, #tpu.memory_space<vmem>>, %arg1: memref<32x96xf32, #tpu.memory_space<vmem>>, %arg2: memref<1x96xf32, #tpu.memory_space<vmem>>, %arg3: memref<4x8x32xf32, #tpu.memory_space<vmem>>, %arg4: memref<1x32xf32, #tpu.memory_space<vmem>>, %arg5: memref<16x32xf32, #tpu.memory_space<vmem>>, %arg6: memref<2x4x8x8xf32, #tpu.memory_space<vmem>>) attributes {dimension_semantics = [], scalar_prefetch = 0 : i64, scratch_operands = 0 : i64, tpu.core_type = #tpu.core_type<tc>} {
    %c0 = arith.constant 0 : index
    %c0_0 = arith.constant 0 : index
    %0 = vector.load %arg0[%c0, %c0_0] : memref<16x32xf32, #tpu.memory_space<vmem>>, vector<16x32xf32>
    %c0_1 = arith.constant 0 : index
    %c0_2 = arith.constant 0 : index
    %1 = vector.load %arg1[%c0_1, %c0_2] : memref<32x96xf32, #tpu.memory_space<vmem>>, vector<32x96xf32>
    %cst = arith.constant dense<0.000000e+00> : vector<16x96xf32>
    %2 = tpu.matmul %0, %1, %cst {dimension_numbers = #tpu.dot_dimension_numbers<[1], [0], [0], [1], [0, 0, 1, 1], [], []>} : vector<16x32xf32>, vector<32x96xf32>, vector<16x96xf32> -> vector<16x96xf32>
    %c0_3 = arith.constant 0 : index
    %c0_4 = arith.constant 0 : index
    %3 = vector.load %arg2[%c0_3, %c0_4] : memref<1x96xf32, #tpu.memory_space<vmem>>, vector<1x96xf32>
    %4 = vector.broadcast %3 : vector<1x96xf32> to vector<16x96xf32>
    %5 = arith.addf %2, %4 : vector<16x96xf32>
    %6 = vector.extract_strided_slice %5 {offsets = [0, 0], sizes = [16, 32], strides = [1, 1]} : vector<16x96xf32> to vector<16x32xf32>
    %7 = vector.extract_strided_slice %5 {offsets = [0, 32], sizes = [16, 32], strides = [1, 1]} : vector<16x96xf32> to vector<16x32xf32>
    %8 = vector.extract_strided_slice %5 {offsets = [0, 64], sizes = [16, 32], strides = [1, 1]} : vector<16x96xf32> to vector<16x32xf32>
    %cst_5 = arith.constant 0.000000e+00 : f32
    %9 = vector.broadcast %cst_5 : f32 to vector<16x32xf32>
    %10 = vector.extract_strided_slice %6 {offsets = [0, 0], sizes = [16, 8], strides = [1, 1]} : vector<16x32xf32> to vector<16x8xf32>
    %11 = vector.shape_cast %10 : vector<16x8xf32> to vector<2x8x8xf32>
    %12 = vector.extract_strided_slice %7 {offsets = [0, 0], sizes = [16, 8], strides = [1, 1]} : vector<16x32xf32> to vector<16x8xf32>
    %13 = vector.shape_cast %12 : vector<16x8xf32> to vector<2x8x8xf32>
    %14 = vector.extract_strided_slice %8 {offsets = [0, 0], sizes = [16, 8], strides = [1, 1]} : vector<16x32xf32> to vector<16x8xf32>
    %15 = vector.shape_cast %14 : vector<16x8xf32> to vector<2x8x8xf32>
    "tpu.trace_start"() <{level = 10 : i32, message = "bqd,bkd->bqk"}> : () -> ()
    %cst_6 = arith.constant dense<0.000000e+00> : vector<2x8x8xf32>
    %16 = tpu.matmul %11, %13, %cst_6 {dimension_numbers = #tpu.dot_dimension_numbers<[2], [2], [1], [1], [0, 0, 0, 1, 1, 1], [0], [0]>} : vector<2x8x8xf32>, vector<2x8x8xf32>, vector<2x8x8xf32> -> vector<2x8x8xf32>
    "tpu.trace_stop"() : () -> ()
    %cst_7 = arith.constant dense<0xFF800000> : vector<2x8xf32>
    %17 = vector.multi_reduction <maximumf>, %16, %cst_7 [2] : vector<2x8x8xf32> to vector<2x8xf32>
    %18 = vector.shape_cast %17 : vector<2x8xf32> to vector<2x8x1xf32>
    %19 = vector.broadcast %18 : vector<2x8x1xf32> to vector<2x8x8xf32>
    %20 = arith.subf %16, %19 : vector<2x8x8xf32>
    %21 = math.exp %20 : vector<2x8x8xf32>
    %cst_8 = arith.constant dense<0.000000e+00> : vector<2x8xf32>
    %22 = vector.multi_reduction <add>, %21, %cst_8 [2] : vector<2x8x8xf32> to vector<2x8xf32>
    %23 = vector.shape_cast %22 : vector<2x8xf32> to vector<2x8x1xf32>
    %cst_9 = arith.constant 1.000000e+00 : f32
    %24 = vector.broadcast %cst_9 : f32 to vector<2x8x1xf32>
    %25 = arith.divf %24, %23 : vector<2x8x1xf32>
    %26 = vector.broadcast %25 : vector<2x8x1xf32> to vector<2x8x8xf32>
    %27 = arith.mulf %21, %26 : vector<2x8x8xf32>
    %c0_10 = arith.constant 0 : index
    %c0_11 = arith.constant 0 : index
    %c0_12 = arith.constant 0 : index
    %c0_13 = arith.constant 0 : index
    %28 = vector.load %arg6[%c0_10, %c0_11, %c0_12, %c0_13] : memref<2x4x8x8xf32, #tpu.memory_space<vmem>>, vector<2x1x8x8xf32>
    %29 = vector.shape_cast %28 : vector<2x1x8x8xf32> to vector<2x8x8xf32>
    %30 = vector.shape_cast %27 : vector<2x8x8xf32> to vector<2x1x8x8xf32>
    tpu.vector_store %arg6[%c0_10, %c0_11, %c0_12, %c0_13], %30 {strides = array<i32>} : memref<2x4x8x8xf32, #tpu.memory_space<vmem>>, vector<2x1x8x8xf32>,
    "tpu.trace_start"() <{level = 10 : i32, message = "bqk,bkd->bqd"}> : () -> ()
    %cst_14 = arith.constant dense<0.000000e+00> : vector<2x8x8xf32>
    %31 = tpu.matmul %27, %15, %cst_14 {dimension_numbers = #tpu.dot_dimension_numbers<[2], [1], [1], [2], [0, 0, 0, 1, 1, 2], [0], [0]>} : vector<2x8x8xf32>, vector<2x8x8xf32>, vector<2x8x8xf32> -> vector<2x8x8xf32>
    "tpu.trace_stop"() : () -> ()
    %32 = vector.shape_cast %31 : vector<2x8x8xf32> to vector<16x8xf32>
    %c0_15 = arith.constant 0 : index
    %c0_16 = arith.constant 0 : index
    %c0_17 = arith.constant 0 : index
    %33 = vector.load %arg3[%c0_15, %c0_16, %c0_17] : memref<4x8x32xf32, #tpu.memory_space<vmem>>, vector<1x8x32xf32>
    %34 = vector.shape_cast %33 : vector<1x8x32xf32> to vector<8x32xf32>
    %cst_18 = arith.constant dense<0.000000e+00> : vector<16x32xf32>
    %35 = tpu.matmul %32, %34, %cst_18 {dimension_numbers = #tpu.dot_dimension_numbers<[1], [0], [0], [1], [0, 0, 1, 1], [], []>} : vector<16x8xf32>, vector<8x32xf32>, vector<16x32xf32> -> vector<16x32xf32>
    %36 = arith.addf %9, %35 : vector<16x32xf32>
    %37 = vector.extract_strided_slice %6 {offsets = [0, 8], sizes = [16, 8], strides = [1, 1]} : vector<16x32xf32> to vector<16x8xf32>
    %38 = vector.shape_cast %37 : vector<16x8xf32> to vector<2x8x8xf32>
    %39 = vector.extract_strided_slice %7 {offsets = [0, 8], sizes = [16, 8], strides = [1, 1]} : vector<16x32xf32> to vector<16x8xf32>
    %40 = vector.shape_cast %39 : vector<16x8xf32> to vector<2x8x8xf32>
    %41 = vector.extract_strided_slice %8 {offsets = [0, 8], sizes = [16, 8], strides = [1, 1]} : vector<16x32xf32> to vector<16x8xf32>
    %42 = vector.shape_cast %41 : vector<16x8xf32> to vector<2x8x8xf32>
    "tpu.trace_start"() <{level = 10 : i32, message = "bqd,bkd->bqk"}> : () -> ()
    %cst_19 = arith.constant dense<0.000000e+00> : vector<2x8x8xf32>
    %43 = tpu.matmul %38, %40, %cst_19 {dimension_numbers = #tpu.dot_dimension_numbers<[2], [2], [1], [1], [0, 0, 0, 1, 1, 1], [0], [0]>} : vector<2x8x8xf32>, vector<2x8x8xf32>, vector<2x8x8xf32> -> vector<2x8x8xf32>
    "tpu.trace_stop"() : () -> ()
    %cst_20 = arith.constant dense<0xFF800000> : vector<2x8xf32>
    %44 = vector.multi_reduction <maximumf>, %43, %cst_20 [2] : vector<2x8x8xf32> to vector<2x8xf32>
    %45 = vector.shape_cast %44 : vector<2x8xf32> to vector<2x8x1xf32>
    %46 = vector.broadcast %45 : vector<2x8x1xf32> to vector<2x8x8xf32>
    %47 = arith.subf %43, %46 : vector<2x8x8xf32>
    %48 = math.exp %47 : vector<2x8x8xf32>
    %cst_21 = arith.constant dense<0.000000e+00> : vector<2x8xf32>
    %49 = vector.multi_reduction <add>, %48, %cst_21 [2] : vector<2x8x8xf32> to vector<2x8xf32>
    %50 = vector.shape_cast %49 : vector<2x8xf32> to vector<2x8x1xf32>
    %cst_22 = arith.constant 1.000000e+00 : f32
    %51 = vector.broadcast %cst_22 : f32 to vector<2x8x1xf32>
    %52 = arith.divf %51, %50 : vector<2x8x1xf32>
    %53 = vector.broadcast %52 : vector<2x8x1xf32> to vector<2x8x8xf32>
    %54 = arith.mulf %48, %53 : vector<2x8x8xf32>
    %c0_23 = arith.constant 0 : index
    %c1 = arith.constant 1 : index
    %c0_24 = arith.constant 0 : index
    %c0_25 = arith.constant 0 : index
    %55 = vector.load %arg6[%c0_23, %c1, %c0_24, %c0_25] : memref<2x4x8x8xf32, #tpu.memory_space<vmem>>, vector<2x1x8x8xf32>
    %56 = vector.shape_cast %55 : vector<2x1x8x8xf32> to vector<2x8x8xf32>
    %57 = vector.shape_cast %54 : vector<2x8x8xf32> to vector<2x1x8x8xf32>
    tpu.vector_store %arg6[%c0_23, %c1, %c0_24, %c0_25], %57 {strides = array<i32>} : memref<2x4x8x8xf32, #tpu.memory_space<vmem>>, vector<2x1x8x8xf32>,
    "tpu.trace_start"() <{level = 10 : i32, message = "bqk,bkd->bqd"}> : () -> ()
    %cst_26 = arith.constant dense<0.000000e+00> : vector<2x8x8xf32>
    %58 = tpu.matmul %54, %42, %cst_26 {dimension_numbers = #tpu.dot_dimension_numbers<[2], [1], [1], [2], [0, 0, 0, 1, 1, 2], [0], [0]>} : vector<2x8x8xf32>, vector<2x8x8xf32>, vector<2x8x8xf32> -> vector<2x8x8xf32>
    "tpu.trace_stop"() : () -> ()
    %59 = vector.shape_cast %58 : vector<2x8x8xf32> to vector<16x8xf32>
    %c1_27 = arith.constant 1 : index
    %c0_28 = arith.constant 0 : index
    %c0_29 = arith.constant 0 : index
    %60 = vector.load %arg3[%c1_27, %c0_28, %c0_29] : memref<4x8x32xf32, #tpu.memory_space<vmem>>, vector<1x8x32xf32>
    %61 = vector.shape_cast %60 : vector<1x8x32xf32> to vector<8x32xf32>
    %cst_30 = arith.constant dense<0.000000e+00> : vector<16x32xf32>
    %62 = tpu.matmul %59, %61, %cst_30 {dimension_numbers = #tpu.dot_dimension_numbers<[1], [0], [0], [1], [0, 0, 1, 1], [], []>} : vector<16x8xf32>, vector<8x32xf32>, vector<16x32xf32> -> vector<16x32xf32>
    %63 = arith.addf %36, %62 : vector<16x32xf32>
    %64 = vector.extract_strided_slice %6 {offsets = [0, 16], sizes = [16, 8], strides = [1, 1]} : vector<16x32xf32> to vector<16x8xf32>
    %65 = vector.shape_cast %64 : vector<16x8xf32> to vector<2x8x8xf32>
    %66 = vector.extract_strided_slice %7 {offsets = [0, 16], sizes = [16, 8], strides = [1, 1]} : vector<16x32xf32> to vector<16x8xf32>
    %67 = vector.shape_cast %66 : vector<16x8xf32> to vector<2x8x8xf32>
    %68 = vector.extract_strided_slice %8 {offsets = [0, 16], sizes = [16, 8], strides = [1, 1]} : vector<16x32xf32> to vector<16x8xf32>
    %69 = vector.shape_cast %68 : vector<16x8xf32> to vector<2x8x8xf32>
    "tpu.trace_start"() <{level = 10 : i32, message = "bqd,bkd->bqk"}> : () -> ()
    %cst_31 = arith.constant dense<0.000000e+00> : vector<2x8x8xf32>
    %70 = tpu.matmul %65, %67, %cst_31 {dimension_numbers = #tpu.dot_dimension_numbers<[2], [2], [1], [1], [0, 0, 0, 1, 1, 1], [0], [0]>} : vector<2x8x8xf32>, vector<2x8x8xf32>, vector<2x8x8xf32> -> vector<2x8x8xf32>
    "tpu.trace_stop"() : () -> ()
    %cst_32 = arith.constant dense<0xFF800000> : vector<2x8xf32>
    %71 = vector.multi_reduction <maximumf>, %70, %cst_32 [2] : vector<2x8x8xf32> to vector<2x8xf32>
    %72 = vector.shape_cast %71 : vector<2x8xf32> to vector<2x8x1xf32>
    %73 = vector.broadcast %72 : vector<2x8x1xf32> to vector<2x8x8xf32>
    %74 = arith.subf %70, %73 : vector<2x8x8xf32>
    %75 = math.exp %74 : vector<2x8x8xf32>
    %cst_33 = arith.constant dense<0.000000e+00> : vector<2x8xf32>
    %76 = vector.multi_reduction <add>, %75, %cst_33 [2] : vector<2x8x8xf32> to vector<2x8xf32>
    %77 = vector.shape_cast %76 : vector<2x8xf32> to vector<2x8x1xf32>
    %cst_34 = arith.constant 1.000000e+00 : f32
    %78 = vector.broadcast %cst_34 : f32 to vector<2x8x1xf32>
    %79 = arith.divf %78, %77 : vector<2x8x1xf32>
    %80 = vector.broadcast %79 : vector<2x8x1xf32> to vector<2x8x8xf32>
    %81 = arith.mulf %75, %80 : vector<2x8x8xf32>
    %c0_35 = arith.constant 0 : index
    %c2 = arith.constant 2 : index
    %c0_36 = arith.constant 0 : index
    %c0_37 = arith.constant 0 : index
    %82 = vector.load %arg6[%c0_35, %c2, %c0_36, %c0_37] : memref<2x4x8x8xf32, #tpu.memory_space<vmem>>, vector<2x1x8x8xf32>
    %83 = vector.shape_cast %82 : vector<2x1x8x8xf32> to vector<2x8x8xf32>
    %84 = vector.shape_cast %81 : vector<2x8x8xf32> to vector<2x1x8x8xf32>
    tpu.vector_store %arg6[%c0_35, %c2, %c0_36, %c0_37], %84 {strides = array<i32>} : memref<2x4x8x8xf32, #tpu.memory_space<vmem>>, vector<2x1x8x8xf32>,
    "tpu.trace_start"() <{level = 10 : i32, message = "bqk,bkd->bqd"}> : () -> ()
    %cst_38 = arith.constant dense<0.000000e+00> : vector<2x8x8xf32>
    %85 = tpu.matmul %81, %69, %cst_38 {dimension_numbers = #tpu.dot_dimension_numbers<[2], [1], [1], [2], [0, 0, 0, 1, 1, 2], [0], [0]>} : vector<2x8x8xf32>, vector<2x8x8xf32>, vector<2x8x8xf32> -> vector<2x8x8xf32>
    "tpu.trace_stop"() : () -> ()
    %86 = vector.shape_cast %85 : vector<2x8x8xf32> to vector<16x8xf32>
    %c2_39 = arith.constant 2 : index
    %c0_40 = arith.constant 0 : index
    %c0_41 = arith.constant 0 : index
    %87 = vector.load %arg3[%c2_39, %c0_40, %c0_41] : memref<4x8x32xf32, #tpu.memory_space<vmem>>, vector<1x8x32xf32>
    %88 = vector.shape_cast %87 : vector<1x8x32xf32> to vector<8x32xf32>
    %cst_42 = arith.constant dense<0.000000e+00> : vector<16x32xf32>
    %89 = tpu.matmul %86, %88, %cst_42 {dimension_numbers = #tpu.dot_dimension_numbers<[1], [0], [0], [1], [0, 0, 1, 1], [], []>} : vector<16x8xf32>, vector<8x32xf32>, vector<16x32xf32> -> vector<16x32xf32>
    %90 = arith.addf %63, %89 : vector<16x32xf32>
    %91 = vector.extract_strided_slice %6 {offsets = [0, 24], sizes = [16, 8], strides = [1, 1]} : vector<16x32xf32> to vector<16x8xf32>
    %92 = vector.shape_cast %91 : vector<16x8xf32> to vector<2x8x8xf32>
    %93 = vector.extract_strided_slice %7 {offsets = [0, 24], sizes = [16, 8], strides = [1, 1]} : vector<16x32xf32> to vector<16x8xf32>
    %94 = vector.shape_cast %93 : vector<16x8xf32> to vector<2x8x8xf32>
    %95 = vector.extract_strided_slice %8 {offsets = [0, 24], sizes = [16, 8], strides = [1, 1]} : vector<16x32xf32> to vector<16x8xf32>
    %96 = vector.shape_cast %95 : vector<16x8xf32> to vector<2x8x8xf32>
    "tpu.trace_start"() <{level = 10 : i32, message = "bqd,bkd->bqk"}> : () -> ()
    %cst_43 = arith.constant dense<0.000000e+00> : vector<2x8x8xf32>
    %97 = tpu.matmul %92, %94, %cst_43 {dimension_numbers = #tpu.dot_dimension_numbers<[2], [2], [1], [1], [0, 0, 0, 1, 1, 1], [0], [0]>} : vector<2x8x8xf32>, vector<2x8x8xf32>, vector<2x8x8xf32> -> vector<2x8x8xf32>
    "tpu.trace_stop"() : () -> ()
    %cst_44 = arith.constant dense<0xFF800000> : vector<2x8xf32>
    %98 = vector.multi_reduction <maximumf>, %97, %cst_44 [2] : vector<2x8x8xf32> to vector<2x8xf32>
    %99 = vector.shape_cast %98 : vector<2x8xf32> to vector<2x8x1xf32>
    %100 = vector.broadcast %99 : vector<2x8x1xf32> to vector<2x8x8xf32>
    %101 = arith.subf %97, %100 : vector<2x8x8xf32>
    %102 = math.exp %101 : vector<2x8x8xf32>
    %cst_45 = arith.constant dense<0.000000e+00> : vector<2x8xf32>
    %103 = vector.multi_reduction <add>, %102, %cst_45 [2] : vector<2x8x8xf32> to vector<2x8xf32>
    %104 = vector.shape_cast %103 : vector<2x8xf32> to vector<2x8x1xf32>
    %cst_46 = arith.constant 1.000000e+00 : f32
    %105 = vector.broadcast %cst_46 : f32 to vector<2x8x1xf32>
    %106 = arith.divf %105, %104 : vector<2x8x1xf32>
    %107 = vector.broadcast %106 : vector<2x8x1xf32> to vector<2x8x8xf32>
    %108 = arith.mulf %102, %107 : vector<2x8x8xf32>
    %c0_47 = arith.constant 0 : index
    %c3 = arith.constant 3 : index
    %c0_48 = arith.constant 0 : index
    %c0_49 = arith.constant 0 : index
    %109 = vector.load %arg6[%c0_47, %c3, %c0_48, %c0_49] : memref<2x4x8x8xf32, #tpu.memory_space<vmem>>, vector<2x1x8x8xf32>
    %110 = vector.shape_cast %109 : vector<2x1x8x8xf32> to vector<2x8x8xf32>
    %111 = vector.shape_cast %108 : vector<2x8x8xf32> to vector<2x1x8x8xf32>
    tpu.vector_store %arg6[%c0_47, %c3, %c0_48, %c0_49], %111 {strides = array<i32>} : memref<2x4x8x8xf32, #tpu.memory_space<vmem>>, vector<2x1x8x8xf32>,
    "tpu.trace_start"() <{level = 10 : i32, message = "bqk,bkd->bqd"}> : () -> ()
    %cst_50 = arith.constant dense<0.000000e+00> : vector<2x8x8xf32>
    %112 = tpu.matmul %108, %96, %cst_50 {dimension_numbers = #tpu.dot_dimension_numbers<[2], [1], [1], [2], [0, 0, 0, 1, 1, 2], [0], [0]>} : vector<2x8x8xf32>, vector<2x8x8xf32>, vector<2x8x8xf32> -> vector<2x8x8xf32>
    "tpu.trace_stop"() : () -> ()
    %113 = vector.shape_cast %112 : vector<2x8x8xf32> to vector<16x8xf32>
    %c3_51 = arith.constant 3 : index
    %c0_52 = arith.constant 0 : index
    %c0_53 = arith.constant 0 : index
    %114 = vector.load %arg3[%c3_51, %c0_52, %c0_53] : memref<4x8x32xf32, #tpu.memory_space<vmem>>, vector<1x8x32xf32>
    %115 = vector.shape_cast %114 : vector<1x8x32xf32> to vector<8x32xf32>
    %cst_54 = arith.constant dense<0.000000e+00> : vector<16x32xf32>
    %116 = tpu.matmul %113, %115, %cst_54 {dimension_numbers = #tpu.dot_dimension_numbers<[1], [0], [0], [1], [0, 0, 1, 1], [], []>} : vector<16x8xf32>, vector<8x32xf32>, vector<16x32xf32> -> vector<16x32xf32>
    %117 = arith.addf %90, %116 : vector<16x32xf32>
    %c0_55 = arith.constant 0 : index
    %c0_56 = arith.constant 0 : index
    %118 = vector.load %arg4[%c0_55, %c0_56] : memref<1x32xf32, #tpu.memory_space<vmem>>, vector<1x32xf32>
    %119 = vector.broadcast %118 : vector<1x32xf32> to vector<16x32xf32>
    %120 = arith.addf %117, %119 : vector<16x32xf32>
    %c0_57 = arith.constant 0 : index
    %c0_58 = arith.constant 0 : index
    %121 = vector.load %arg5[%c0_57, %c0_58] : memref<16x32xf32, #tpu.memory_space<vmem>>, vector<16x32xf32>
    tpu.vector_store %arg5[%c0_57, %c0_58], %120 {strides = array<i32>} : memref<16x32xf32, #tpu.memory_space<vmem>>, vector<16x32xf32>,
    return
  }
}

</mosaic_0001>

<bundles_post_ra>
// kernel: multi_head_attention.1
= control target key start
LH: loop header
LB: loop body
LE: loop exit
PB: predicated region body
PF: predicated region fallthrough
CT: control target
= control target key end

     0   :  { %12 = vsyncpa [#allocation3], 0  ;;  %s2548_s0 = inlined_call_operand.hbm [shape: f32[16,32], index: 0, kind: input, shape index: {}]   ;;  %s2549_s1 = inlined_call_operand.hbm [shape: f32[32,96], index: 1, kind: input, shape index: {}]   ;;  %s2550_s2 = inlined_call_operand.vmem [shape: f32[1,96], index: 2, kind: input, shape index: {}]   ;;  %s2551_s3 = inlined_call_operand.hbm [shape: f32[4,8,32], index: 3, kind: input, shape index: {}]   ;;  %s2552_s4 = inlined_call_operand.vmem [shape: f32[1,32], index: 4, kind: input, shape index: {}]   ;;  %s2553_s5 = inlined_call_operand.hbm [shape: f32[16,32], index: 5, kind: output, shape index: {0}]   ;;  %s2554_s6 = inlined_call_operand.hbm [shape: f32[2,4,8,8], index: 6, kind: output, shape index: {1}]  }
   0x1   :  { %13 = vsyncpa [#allocation6], 0 }
   0x2   :  { %14 = vsyncpa [#allocation4], 0 }
   0x3   :  { %15 = vsyncpa [#allocation10], 0  ;;  %s2259_s21 = smov [#allocation5]   ;;  %s2260_s23 = smov [#allocation2]  }
   0x4   :  { %s33_s22 = sshll.u32 %s2259_s21, 4  ;;  %s21_s24 = sshll.u32 %s2260_s23, 4  ;;  %s34_s22 = int_to_ptr.vmem [resolvable:$true] %s33_s22  ;;  %s2314_s24 = int_to_ptr.vmem [resolvable:$true] %s21_s24 }
   0x5   :  { %s2141_s27 = scalar_lea.hbm %s2549_s1, 512 }
   0x6   :  { %p2142_p0 = scmp.ne.s32.totalorder %s2549_s1, %s2141_s27  ;;  %p2145_p1 = scmp.lt.u32.totalorder %s2141_s27, %s2549_s1 }
   0x8   :  { %p2147_p2 = pnand %p2145_p1, %p2142_p0 }
   0xa   :  { %2150 = shalt.err (!%p2147_p2)
}
   0xb   :  { %s2151_s8 = scalar_lea.vmem %s34_s22, 512  ;;  %p2156_p4 = scmp.lt.s32.totalorder %s34_s22, %s34_s22 }
   0xc   :  { %p2152_p3 = scmp.ne.s32.totalorder %s34_s22, %s2151_s8  ;;  %p2157_p5 = scmp.lt.s32.totalorder %s2151_s8, %s2151_s8 }
   0xe   :  { %p2158_p6 = por %p2157_p5, %p2156_p4 }
  0x10   :  { %p2159_p7 = pnand %p2158_p6, %p2152_p3 }
  0x12   :  { %2162 = shalt.err (!%p2159_p7)
}
  0x13   :  { %s2261_s9 = smov 128   ;;  %s2262_s10 = smov 8  }
  0x14   :  { %39 = dma.hbm_to_vmem [thread:$0]  %s2549_s1, 512, %s34_s22, [#allocation6], %s2261_s9, %s2261_s9, %s2262_s10  }
  0x15   :  { %s2163_s15 = scalar_lea.hbm %s2548_s0, 256 }
  0x16   :  { %p2164_p8 = scmp.ne.s32.totalorder %s2548_s0, %s2163_s15  ;;  %p2167_p9 = scmp.lt.u32.totalorder %s2163_s15, %s2548_s0 }
  0x18   :  { %p2169_p10 = pnand %p2167_p9, %p2164_p8 }
  0x1a   :  { %2172 = shalt.err (!%p2169_p10)
}
  0x1b   :  { %s2173_s20 = scalar_lea.vmem %s2314_s24, 256  ;;  %p2178_p12 = scmp.lt.s32.totalorder %s2314_s24, %s2314_s24 }
  0x1c   :  { %p2174_p11 = scmp.ne.s32.totalorder %s2314_s24, %s2173_s20  ;;  %p2179_p13 = scmp.lt.s32.totalorder %s2173_s20, %s2173_s20 }
  0x1e   :  { %p2180_p0 = por %p2179_p13, %p2178_p12 }
  0x20   :  { %p2181_p1 = pnand %p2180_p0, %p2174_p11 }
  0x22   :  { %2184 = shalt.err (!%p2181_p1)
}
  0x23   :  { %27 = dma.hbm_to_vmem [thread:$0]  %s2548_s0, 256, %s2314_s24, [#allocation3], %s2261_s9, %s2261_s9, %s2262_s10  }
  0x24   :  { %s2263_s22 = smov [#allocation7]   ;;  %s2185_s27 = scalar_lea.hbm %s2551_s3, 512 }
  0x25   :  { %s47_s23 = sshll.u32 %s2263_s22, 4  ;;  %p2186_p2 = scmp.ne.s32.totalorder %s2551_s3, %s2185_s27  ;;  %s48_s23 = int_to_ptr.vmem [resolvable:$true] %s47_s23 }
  0x26   :  { %p2189_p3 = scmp.lt.u32.totalorder %s2185_s27, %s2551_s3 }
  0x28   :  { %p2191_p4 = pnand %p2189_p3, %p2186_p2 }
  0x2a   :  { %2194 = shalt.err (!%p2191_p4)
}
  0x2b   :  { %s2195_s8 = scalar_lea.vmem %s48_s23, 512  ;;  %p2200_p6 = scmp.lt.s32.totalorder %s48_s23, %s48_s23 }
  0x2c   :  { %p2196_p5 = scmp.ne.s32.totalorder %s48_s23, %s2195_s8  ;;  %p2201_p7 = scmp.lt.s32.totalorder %s2195_s8, %s2195_s8 }
  0x2e   :  { %p2202_p8 = por %p2201_p7, %p2200_p6 }
  0x30   :  { %p2203_p9 = pnand %p2202_p8, %p2196_p5 }
  0x32   :  { %2206 = shalt.err (!%p2203_p9)
}
  0x33   :  { %53 = dma.hbm_to_vmem [thread:$0]  %s2551_s3, 512, %s48_s23, [#allocation6], %s2261_s9, %s2261_s9, %s2262_s10  }
  0x34   :  { %2251 = dma.done.wait [#allocation3], 256  }
  0x35   :  { %2252 = vsyncadd [#allocation3], 4294967040 }
  0x36   :  { %2253 = dma.done.wait [#allocation6], 1024  }
  0x37   :  { %2254 = vsyncadd [#allocation6], 4294966272  ;;  %vm78_vm0 = vcmask 261120   ;;  %v67_v0 = vld [vmem:[#allocation5] sm:$0xff]  ;;  %v68_v1 = vld [vmem:[#allocation5 + $0x8] sm:$0xff]  ;;  %v2264_v8 = vmov 0.0  }
  0x38   :  { %v69_v2 = vld [vmem:[#allocation5 + $0x10] sm:$0xff]  ;;  %v2075_v3 = vpack.c.bf16 %v68_v1, %v67_v0  ;;  %v70_v4 = vld [vmem:[#allocation5 + $0x18] sm:$0xff]  ;;  %1975 = vmatprep.subr.mxu1 %v2264_v8  ;;  %vm2265_vm1 = vmmov 0   ;;  %s2266_s12 = smov 96   ;;  %vm163_vm2 = vcmask 64512   ;;  %s2268_s13 = smov 88  }
  0x39   :  { %v65_v5 = vld [vmem:[#allocation2] sm:$0xff]  ;;  %v2079_v6 = vpack.c.bf16 %v70_v4, %v69_v2  ;;  %v66_v7 = vld [vmem:[#allocation2 + $0x8] sm:$0xff]  ;;  %1977 = vmatprep.mubr.msk.f32.mxu1 %vm2265_vm1, %v2264_v8  ;;  %s2269_s14 = smov 120   ;;  %s2270_s15 = smov 56  }
  0x3a   :  { %1972 = vmatprep.mubr.msk.f32.mxu0 %vm78_vm0, %v65_v5  ;;  %2076 = vmatprep.subr.bf16.mxu0 %v2075_v3  ;;  %v1878_v9 = vld [vmem:[%s2550_s2] ss:$0 sm:$0xff]  ;;  %s2267_s2 = smov 64   ;;  %s2271_s16 = smov 112  }
  0x3b   :  { %2078 = vmatpush3.bf16.msra.mxu0 %v2075_v3  ;;  %s2272_s17 = smov 80   ;;  %s2273_s18 = smov 48  }
  0x3c   :  { %2080 = vmatprep.subr.bf16.mxu0 %v2079_v6  ;;  %s2274_s19 = smov 72   ;;  %s2275_s20 = smov 104  }
  0x3d   :  { %s2276_s1 = smov 40   ;;  %s2277_s21 = smov [#allocation9]  }
  0x3e   :  { %s1861_s22 = sshll.u32 %s2277_s21, 4  ;;  %s1862_s22 = int_to_ptr.vmem [resolvable:$true] %s1861_s22 }
  0x3f   :  { %2082 = vmatpush3.bf16.msra.mxu0 %v2079_v6  ;;  %s2207_s23 = scalar_lea.vmem %s1862_s22, 1024  ;;  %p2212_p11 = scmp.lt.s32.totalorder %s1862_s22, %s1862_s22 }
  0x40   :  { %1995 = vmatprep.subr.mxu0 %v2264_v8  ;;  %p2208_p10 = scmp.ne.s32.totalorder %s1862_s22, %s2207_s23  ;;  %p2213_p12 = scmp.lt.s32.totalorder %s2207_s23, %s2207_s23 }
  0x42   :  { %1973 = vmatmul.mubr.msk.f32.vlgmr.msra.gmra.mrb[0].mxu0 %vm78_vm0, %v66_v7  ;;  %p2214_p13 = por %p2213_p12, %p2212_p11 }
  0x43   :  { %1997 = vmatprep.mubr.msk.f32.mxu0 %vm2265_vm1, %v2264_v8 }
  0x44   :  { %p2215_p0 = pnand %p2214_p13, %p2208_p10 }
 0x115   :  { %v1974_v10 = vpop.f32.mrb[0].mxu0 }
 0x116   :  { %v151_v11 = vpop.f32.mrb[1].mxu0  ;;  %v2380_v13 = vadd.f32 %v1974_v10, %v1878_v9 }
 0x117   :  { %v2377_v12 = vadd.f32 %v1878_v9, %v151_v11 }
 0x119   :  { %161 = vrot.lane.b32.xlu0 %v2377_v12, %s2266_s12 }
 0x11d   :  { %239 = vrot.lane.b32.xlu0 %v2380_v13, %s2266_s12 }
 0x18b   :  { %v162_v14 = vpop.permute.xlu0 %161 }
 0x18c   :  { %1976 = vmatpush3.xpose.msk.msra.mxu1 %vm163_vm2, %v162_v14 }
 0x18d   :  { %1980 = vmatprep.subr.mxu1 %v2264_v8 }
 0x18f   :  { %1978 = vmatmul.mubr.msk.f32.vlgmr.msra.gmra.mrb[0].mxu1 %vm163_vm2, %v2377_v12  ;;  %v240_v15 = vpop.permute.xlu0 %239 }
 0x190   :  { %1981 = vmatpush3.xpose.msk.msra.mxu1 %vm163_vm2, %v240_v15  ;;  %1982 = vmatprep.mubr.msk.f32.mxu1 %vm2265_vm1, %v2264_v8 }
 0x191   :  { %1985 = vmatprep.subr.mxu1 %v2264_v8 }
 0x193   :  { %1983 = vmatmul.mubr.msk.f32.vlgmr.msra.gmra.mrb[2].mxu1 %vm163_vm2, %v2380_v13 }
 0x194   :  { %1987 = vmatprep.mubr.msk.f32.mxu1 %vm2265_vm1, %v2264_v8 }
 0x262   :  { %v234_v16 = vpop.f32.mrb[0].mxu1 }
 0x263   :  { %v1979_v17 = vpop.f32.mrb[1].mxu1  ;;  %v315_v18 = vsel %vm163_vm2, %v234_v16, -inf }
 0x264   :  { %316 = vmax.xlane.f32.xlu1 %v315_v18  ;;  %v493_v17 = vld [vmem:[#allocation7] sm:$0xff] }
 0x266   :  { %v311_v19 = vpop.f32.mrb[2].mxu1 }
 0x267   :  { %v1984_v20 = vpop.f32.mrb[3].mxu1  ;;  %v318_v21 = vsel %vm163_vm2, %v311_v19, -inf }
 0x268   :  { %319 = vmax.xlane.f32.xlu1 %v318_v21 }
 0x279   :  { %341 = vrot.lane.b32.xlu1 %v2377_v12, %s2267_s2 }
 0x27d   :  { %417 = vrot.lane.b32.xlu1 %v2380_v13, %s2267_s2 }
 0x281   :  { %574 = vrot.lane.b32.xlu1 %v2380_v13, %s2268_s13 }
 0x2f1   :  { %v317_v22 = vpop.xlane.xlu1 %316 }
 0x2f2   :  { %v321_v23 = vsub.f32 %v234_v16, %v317_v22  ;;  %v830_v16 = vld [vmem:[#allocation7 + $0x8] sm:$0xff] }
 0x2f4   :  { %v323_v24 = vmul.f32 1.442695, %v321_v23 }
 0x2f5   :  { %v320_v25 = vpop.xlane.xlu1 %319 }
 0x2f6   :  { %2109 = vpow2.f32 %v323_v24  ;;  %v322_v26 = vsub.f32 %v311_v19, %v320_v25 }
 0x2f8   :  { %v325_v27 = vmul.f32 1.442695, %v322_v26 }
 0x2f9   :  { %v342_v28 = vpop.permute.xlu1 %341 }
 0x2fa   :  { %2111 = vpow2.f32 %v325_v27  ;;  %1986 = vmatpush3.msra.mxu1 %v342_v28 }
 0x2fb   :  { %1990 = vmatprep.subr.mxu1 %v2264_v8 }
 0x2fd   :  { %v418_v33 = vpop.permute.xlu1 %417 }
 0x300   :  { %v2110_v29 = vpop.eup %2109 }
 0x301   :  { %v327_v30 = vsel %vm163_vm2, %v2110_v29, 0.0  ;;  %v575_v34 = vpop.permute.xlu1 %574 }
 0x302   :  { %328 = vadd.xlane.f32.xlu0 %v327_v30 }
 0x304   :  { %v2112_v31 = vpop.eup %2111 }
 0x305   :  { %v330_v32 = vsel %vm163_vm2, %v2112_v31, 0.0 }
 0x306   :  { %331 = vadd.xlane.f32.xlu1 %v330_v32 }
 0x317   :  { %572 = vrot.lane.b32.xlu1 %v2380_v13, %s2269_s14 }
 0x318   :  { %496 = vrot.lane.b32.xlu0 %v2377_v12, %s2268_s13 }
 0x31b   :  { %494 = vrot.lane.b32.xlu1 %v2377_v12, %s2269_s14 }
 0x38f   :  { %v329_v35 = vpop.xlane.xlu0 %328 }
 0x390   :  { %2113 = vrcp.f32 %v329_v35 }
 0x393   :  { %v332_v36 = vpop.xlane.xlu1 %331  ;;  %v497_v37 = vpop.permute.xlu0 %496 }
 0x394   :  { %2115 = vrcp.f32 %v332_v36  ;;  %1996 = vmatpush3.xpose.msk.msra.mxu0 %vm163_vm2, %v497_v37 }
 0x395   :  { %2005 = vmatprep.subr.mxu0 %v2264_v8 }
 0x397   :  { %v573_v38 = vpop.permute.xlu1 %572 }
 0x39a   :  { %v2114_v39 = vpop.eup %2113 }
 0x39b   :  { %v337_v40 = vmul.f32 %v2114_v39, %v2110_v29  ;;  %v495_v41 = vpop.permute.xlu1 %494 }
 0x39c   :  { %1998 = vmatmul.mubr.msk.f32.vlgmr.msra.gmra.mrb[2].mxu0 %vm163_vm2, %v495_v41 }
 0x39d   :  { %339 = vst.msk [vmem:[#allocation9] sm:$0xff] %vm163_vm2, %v337_v40  ;;  %1988 = vmatmul.mubr.msk.f32.vlgmr.msra.gmra.mrb[4].mxu1 %vm163_vm2, %v337_v40  ;;  %2007 = vmatprep.mubr.msk.f32.mxu0 %vm2265_vm1, %v2264_v8  ;;  %v1329_v40 = vld [vmem:[#allocation7 + $0x10] sm:$0xff] }
 0x39e   :  { %v2116_v42 = vpop.eup %2115  ;;  %1991 = vmatpush3.msra.mxu1 %v418_v33  ;;  %1992 = vmatprep.mubr.msk.f32.mxu1 %vm2265_vm1, %v2264_v8 }
 0x39f   :  { %v338_v43 = vmul.f32 %v2116_v42, %v2112_v31  ;;  %2000 = vmatprep.subr.mxu1 %v2264_v8 }
 0x3a1   :  { %340 = vst.msk [vmem:[#allocation9 + $0x20] sm:$0xff] %vm163_vm2, %v338_v43  ;;  %1993 = vmatmul.mubr.msk.f32.vlgmr.msra.gmra.mrb[6].mxu1 %vm163_vm2, %v338_v43 }
 0x3a2   :  { %2002 = vmatprep.mubr.msk.f32.mxu1 %vm2265_vm1, %v2264_v8 }
 0x3a5   :  { %2001 = vmatpush3.xpose.msk.msra.mxu1 %vm163_vm2, %v575_v34 }
 0x3a6   :  { %2010 = vmatprep.subr.mxu1 %v2264_v8 }
 0x3a8   :  { %2003 = vmatmul.mubr.msk.f32.vlgmr.msra.gmra.mrb[8].mxu1 %vm163_vm2, %v573_v38 }
 0x3a9   :  { %2012 = vmatprep.mubr.msk.f32.mxu1 %vm2265_vm1, %v2264_v8 }
 0x46f   :  { %v568_v44 = vpop.f32.mrb[2].mxu0 }
 0x470   :  { %v2425_v45 = vpop.f32.mrb[4].mxu1  ;;  %v1999_v46 = vpop.f32.mrb[3].mxu0  ;;  %v650_v53 = vsel %vm163_vm2, %v568_v44, -inf }
 0x471   :  { %v1989_v47 = vpop.f32.mrb[5].mxu1 }
 0x474   :  { %v2427_v48 = vpop.f32.mrb[6].mxu1 }
 0x475   :  { %v1994_v49 = vpop.f32.mrb[7].mxu1 }
 0x47b   :  { %v646_v50 = vpop.f32.mrb[8].mxu1 }
 0x47c   :  { %v2004_v51 = vpop.f32.mrb[9].mxu1  ;;  %v653_v52 = vsel %vm163_vm2, %v646_v50, -inf }
 0x47d   :  { %654 = vmax.xlane.f32.xlu1 %v653_v52 }
 0x48e   :  { %753 = vrot.lane.b32.xlu1 %v2380_v13, %s2270_s15 }
 0x492   :  { %993 = vrot.lane.b32.xlu1 %v2377_v12, %s2271_s16 }
 0x496   :  { %1073 = vrot.lane.b32.xlu1 %v2380_v13, %s2272_s17 }
 0x49a   :  { %1071 = vrot.lane.b32.xlu1 %v2380_v13, %s2271_s16 }
 0x4be   :  { %651 = vmax.xlane.f32.xlu1 %v650_v53 }
 0x50a   :  { %v655_v54 = vpop.xlane.xlu1 %654 }
 0x50b   :  { %v657_v55 = vsub.f32 %v646_v50, %v655_v54 }
 0x50d   :  { %v660_v56 = vmul.f32 1.442695, %v657_v55 }
 0x50e   :  { %v754_v57 = vpop.permute.xlu1 %753 }
 0x50f   :  { %2117 = vpow2.f32 %v660_v56  ;;  %2011 = vmatpush3.msra.mxu1 %v754_v57 }
 0x510   :  { %2025 = vmatprep.subr.mxu1 %v2264_v8 }
 0x512   :  { %v994_v60 = vpop.permute.xlu1 %993 }
 0x516   :  { %v1074_v61 = vpop.permute.xlu1 %1073 }
 0x519   :  { %v2118_v58 = vpop.eup %2117 }
 0x51a   :  { %v665_v59 = vsel %vm163_vm2, %v2118_v58, 0.0  ;;  %v1072_v62 = vpop.permute.xlu1 %1071 }
 0x51b   :  { %666 = vadd.xlane.f32.xlu0 %v665_v59 }
 0x531   :  { %995 = vrot.lane.b32.xlu0 %v2377_v12, %s2272_s17 }
 0x54b   :  { %v652_v63 = vpop.xlane.xlu1 %651 }
 0x54c   :  { %v656_v0 = vsub.f32 %v568_v44, %v652_v63 }
 0x54e   :  { %v658_v1 = vmul.f32 1.442695, %v656_v0 }
 0x550   :  { %2119 = vpow2.f32 %v658_v1 }
 0x55a   :  { %v2120_v2 = vpop.eup %2119 }
 0x55b   :  { %v662_v3 = vsel %vm163_vm2, %v2120_v2, 0.0 }
 0x55c   :  { %663 = vadd.xlane.f32.xlu0 %v662_v3 }
 0x572   :  { %677 = vrot.lane.b32.xlu0 %v2377_v12, %s2270_s15 }
 0x576   :  { %1252 = vrot.lane.b32.xlu0 %v2380_v13, %s2273_s18 }
 0x57a   :  { %1415 = vrot.lane.b32.xlu0 %v2377_v12, %s2274_s19 }
 0x57e   :  { %1493 = vrot.lane.b32.xlu0 %v2380_v13, %s2274_s19 }
 0x582   :  { %1413 = vrot.lane.b32.xlu0 %v2377_v12, %s2275_s20 }
 0x5a8   :  { %v667_v4 = vpop.xlane.xlu0 %666 }
 0x5a9   :  { %2121 = vrcp.f32 %v667_v4 }
 0x5ac   :  { %v996_v7 = vpop.permute.xlu0 %995 }
 0x5b3   :  { %v2122_v5 = vpop.eup %2121 }
 0x5b4   :  { %v673_v6 = vmul.f32 %v2122_v5, %v2118_v58 }
 0x5b6   :  { %676 = vst.msk [vmem:[#allocation9 + $0x28] sm:$0xff] %vm163_vm2, %v673_v6  ;;  %2013 = vmatmul.mubr.msk.f32.vlgmr.msra.gmra.mrb[10].mxu1 %vm163_vm2, %v673_v6 }
 0x5b7   :  { %2026 = vmatpush3.xpose.msk.msra.mxu1 %vm163_vm2, %v996_v7  ;;  %2027 = vmatprep.mubr.msk.f32.mxu1 %vm2265_vm1, %v2264_v8 }
 0x5b8   :  { %2030 = vmatprep.subr.mxu1 %v2264_v8 }
 0x5ba   :  { %2028 = vmatmul.mubr.msk.f32.vlgmr.msra.gmra.mrb[12].mxu1 %vm163_vm2, %v994_v60 }
 0x5bb   :  { %2031 = vmatpush3.xpose.msk.msra.mxu1 %vm163_vm2, %v1074_v61  ;;  %2032 = vmatprep.mubr.msk.f32.mxu1 %vm2265_vm1, %v2264_v8 }
 0x5bc   :  { %2040 = vmatprep.subr.mxu1 %v2264_v8 }
 0x5be   :  { %2033 = vmatmul.mubr.msk.f32.vlgmr.msra.gmra.mrb[14].mxu1 %vm163_vm2, %v1072_v62 }
 0x5bf   :  { %2042 = vmatprep.mubr.msk.f32.mxu1 %vm2265_vm1, %v2264_v8 }
 0x5e9   :  { %v664_v9 = vpop.xlane.xlu0 %663 }
 0x5ea   :  { %2123 = vrcp.f32 %v664_v9 }
 0x5ed   :  { %v678_v10 = vpop.permute.xlu0 %677 }
 0x5ee   :  { %2006 = vmatpush3.msra.mxu0 %v678_v10  ;;  %v1749_v10 = vld [vmem:[#allocation7 + $0x18] sm:$0xff] }
 0x5ef   :  { %2015 = vmatprep.subr.mxu0 %v830_v16 }
 0x5f1   :  { %v1253_v11 = vpop.permute.xlu0 %1252 }
 0x5f2   :  { %2041 = vmatpush3.msra.mxu1 %v1253_v11 }
 0x5f3   :  { %2050 = vmatprep.subr.mxu1 %v2264_v8 }
 0x5f4   :  { %v2124_v14 = vpop.eup %2123 }
 0x5f5   :  { %v672_v15 = vmul.f32 %v2124_v14, %v2120_v2  ;;  %v1416_v42 = vpop.permute.xlu0 %1415 }
 0x5f7   :  { %675 = vst.msk [vmem:[#allocation9 + $0x8] sm:$0xff] %vm163_vm2, %v672_v15  ;;  %2008 = vmatmul.mubr.msk.f32.vlgmr.msra.gmra.mrb[4].mxu0 %vm163_vm2, %v672_v15 }
 0x5f8   :  { %2016 = vmatpush3.msra.mxu0 %v830_v16 }
 0x5f9   :  { %2020 = vmatprep.subr.mxu0 %v493_v17  ;;  %v1494_v46 = vpop.permute.xlu0 %1493 }
 0x689   :  { %v825_v18 = vpop.f32.mrb[10].mxu1 }
 0x68a   :  { %v2014_v19 = vpop.f32.mrb[11].mxu1 }
 0x68d   :  { %v1067_v20 = vpop.f32.mrb[12].mxu1 }
 0x68e   :  { %v2029_v21 = vpop.f32.mrb[13].mxu1  ;;  %v1149_v22 = vsel %vm163_vm2, %v1067_v20, -inf }
 0x68f   :  { %1150 = vmax.xlane.f32.xlu1 %v1149_v22 }
 0x691   :  { %v1145_v23 = vpop.f32.mrb[14].mxu1 }
 0x692   :  { %v2034_v24 = vpop.f32.mrb[15].mxu1  ;;  %v1152_v25 = vsel %vm163_vm2, %v1145_v23, -inf }
 0x693   :  { %1153 = vmax.xlane.f32.xlu1 %v1152_v25 }
 0x6ca   :  { %v749_v26 = vpop.f32.mrb[4].mxu0 }
 0x6cb   :  { %v2009_v27 = vpop.f32.mrb[5].mxu0  ;;  %2017 = vmatprep.mubr.msk.f32.mxu0 %vm163_vm2, %v749_v26 }
 0x6cc   :  { %2018 = vmatmul.mubr.msk.f32.vlgmr.msra.gmra.mrb[6].mxu0 %vm163_vm2, %v825_v18 }
 0x6cd   :  { %2022 = vmatprep.mubr.msk.f32.mxu0 %vm163_vm2, %v2425_v45  ;;  %2021 = vmatpush3.msra.mxu0 %v493_v17 }
 0x6ce   :  { %2035 = vmatprep.subr.mxu0 %v2264_v8 }
 0x6d4   :  { %2023 = vmatmul.mubr.msk.f32.vlgmr.msra.gmra.mrb[6].mxu0 %vm163_vm2, %v2427_v48  ;;  %v1414_v48 = vpop.permute.xlu0 %1413 }
 0x6d5   :  { %2037 = vmatprep.mubr.msk.f32.mxu0 %vm2265_vm1, %v2264_v8 }
 0x71c   :  { %v1151_v28 = vpop.xlane.xlu1 %1150 }
 0x71d   :  { %v1155_v29 = vsub.f32 %v1067_v20, %v1151_v28 }
 0x71f   :  { %v1157_v30 = vmul.f32 1.442695, %v1155_v29 }
 0x720   :  { %v1154_v31 = vpop.xlane.xlu1 %1153 }
 0x721   :  { %2125 = vpow2.f32 %v1157_v30  ;;  %v1156_v32 = vsub.f32 %v1145_v23, %v1154_v31 }
 0x723   :  { %v1159_v33 = vmul.f32 1.442695, %v1156_v32 }
 0x725   :  { %2127 = vpow2.f32 %v1159_v33 }
 0x72b   :  { %v2126_v34 = vpop.eup %2125 }
 0x72c   :  { %v1161_v35 = vsel %vm163_vm2, %v2126_v34, 0.0 }
 0x72d   :  { %1162 = vadd.xlane.f32.xlu1 %v1161_v35 }
 0x72f   :  { %v2128_v36 = vpop.eup %2127 }
 0x730   :  { %v1164_v37 = vsel %vm163_vm2, %v2128_v36, 0.0 }
 0x731   :  { %1165 = vadd.xlane.f32.xlu1 %v1164_v37 }
 0x742   :  { %1176 = vrot.lane.b32.xlu1 %v2377_v12, %s2273_s18 }
 0x746   :  { %1491 = vrot.lane.b32.xlu1 %v2380_v13, %s2275_s20 }
 0x7ba   :  { %v1163_v38 = vpop.xlane.xlu1 %1162 }
 0x7bb   :  { %2129 = vrcp.f32 %v1163_v38 }
 0x7be   :  { %v1166_v39 = vpop.xlane.xlu1 %1165 }
 0x7bf   :  { %2131 = vrcp.f32 %v1166_v39 }
 0x7c2   :  { %v1177_v41 = vpop.permute.xlu1 %1176 }
 0x7c3   :  { %2036 = vmatpush3.msra.mxu0 %v1177_v41 }
 0x7c4   :  { %2045 = vmatprep.subr.mxu0 %v1329_v40 }
 0x7c5   :  { %v2130_v43 = vpop.eup %2129 }
 0x7c6   :  { %v1171_v44 = vmul.f32 %v2130_v43, %v2126_v34  ;;  %v1492_v53 = vpop.permute.xlu1 %1491 }
 0x7c8   :  { %1174 = vst.msk [vmem:[#allocation9 + $0x10] sm:$0xff] %vm163_vm2, %v1171_v44  ;;  %2038 = vmatmul.mubr.msk.f32.vlgmr.msra.gmra.mrb[8].mxu0 %vm163_vm2, %v1171_v44 }
 0x7c9   :  { %v2132_v45 = vpop.eup %2131  ;;  %2046 = vmatpush3.msra.mxu0 %v1329_v40 }
 0x7ca   :  { %v1172_v47 = vmul.f32 %v2132_v45, %v2128_v36  ;;  %2055 = vmatprep.subr.mxu0 %v2264_v8 }
 0x7cc   :  { %1175 = vst.msk [vmem:[#allocation9 + $0x30] sm:$0xff] %vm163_vm2, %v1172_v47  ;;  %2043 = vmatmul.mubr.msk.f32.vlgmr.msra.gmra.mrb[16].mxu1 %vm163_vm2, %v1172_v47 }
 0x7cd   :  { %2051 = vmatpush3.xpose.msk.msra.mxu1 %vm163_vm2, %v1416_v42  ;;  %2052 = vmatprep.mubr.msk.f32.mxu1 %vm2265_vm1, %v2264_v8 }
 0x7ce   :  { %2060 = vmatprep.subr.mxu1 %v2264_v8 }
 0x7d0   :  { %2053 = vmatmul.mubr.msk.f32.vlgmr.msra.gmra.mrb[18].mxu1 %vm163_vm2, %v1414_v48 }
 0x7d1   :  { %2062 = vmatprep.mubr.msk.f32.mxu1 %vm2265_vm1, %v2264_v8 }
 0x89b   :  { %v1248_v49 = vpop.f32.mrb[8].mxu0 }
 0x89c   :  { %v2039_v50 = vpop.f32.mrb[9].mxu0  ;;  %2047 = vmatprep.mubr.msk.f32.mxu0 %vm163_vm2, %v1248_v49 }
 0x89f   :  { %v1324_v51 = vpop.f32.mrb[16].mxu1 }
 0x8a0   :  { %v2044_v52 = vpop.f32.mrb[17].mxu1  ;;  %2048 = vmatmul.mubr.msk.f32.vlgmr.msra.gmra.mrb[6].mxu0 %vm163_vm2, %v1324_v51 }
 0x8a1   :  { %2056 = vmatpush3.xpose.msk.msra.mxu0 %vm163_vm2, %v1494_v46  ;;  %2057 = vmatprep.mubr.msk.f32.mxu0 %vm2265_vm1, %v2264_v8 }
 0x8a2   :  { %2065 = vmatprep.subr.mxu0 %v2264_v8 }
 0x8a3   :  { %v1487_v54 = vpop.f32.mrb[18].mxu1 }
 0x8a4   :  { %v2054_v55 = vpop.f32.mrb[19].mxu1  ;;  %2058 = vmatmul.mubr.msk.f32.vlgmr.msra.gmra.mrb[10].mxu0 %vm163_vm2, %v1492_v53  ;;  %v1569_v56 = vsel %vm163_vm2, %v1487_v54, -inf }
 0x8a5   :  { %1570 = vmax.xlane.f32.xlu0 %v1569_v56  ;;  %2067 = vmatprep.mubr.msk.f32.mxu0 %vm2265_vm1, %v2264_v8 }
 0x932   :  { %v1571_v57 = vpop.xlane.xlu0 %1570 }
 0x933   :  { %v1575_v58 = vsub.f32 %v1487_v54, %v1571_v57 }
 0x935   :  { %v1577_v59 = vmul.f32 1.442695, %v1575_v58 }
 0x937   :  { %2133 = vpow2.f32 %v1577_v59 }
 0x941   :  { %v2134_v60 = vpop.eup %2133 }
 0x942   :  { %v1581_v61 = vsel %vm163_vm2, %v2134_v60, 0.0 }
 0x943   :  { %1582 = vadd.xlane.f32.xlu0 %v1581_v61 }
 0x977   :  { %v1565_v62 = vpop.f32.mrb[10].mxu0 }
 0x978   :  { %v2059_v63 = vpop.f32.mrb[11].mxu0  ;;  %v1572_v0 = vsel %vm163_vm2, %v1565_v62, -inf }
 0x979   :  { %1573 = vmax.xlane.f32.xlu1 %v1572_v0 }
 0x98a   :  { %1596 = vrot.lane.b32.xlu1 %v2377_v12, %s2276_s1 }
 0x9d0   :  { %v1583_v1 = vpop.xlane.xlu0 %1582 }
 0x9d1   :  { %2135 = vrcp.f32 %v1583_v1 }
 0x9db   :  { %v2136_v2 = vpop.eup %2135 }
 0x9dc   :  { %v1591_v8 = vmul.f32 %v2136_v2, %v2134_v60 }
 0x9de   :  { %1594 = vst.msk [vmem:[#allocation9 + $0x18] sm:$0xff] %vm163_vm2, %v1591_v8 }
 0xa06   :  { %v1574_v3 = vpop.xlane.xlu1 %1573 }
 0xa07   :  { %v1576_v4 = vsub.f32 %v1565_v62, %v1574_v3 }
 0xa09   :  { %v1579_v5 = vmul.f32 1.442695, %v1576_v4 }
 0xa0a   :  { %v1597_v6 = vpop.permute.xlu1 %1596 }
 0xa0b   :  { %2137 = vpow2.f32 %v1579_v5  ;;  %2061 = vmatpush3.msra.mxu1 %v1597_v6 }
 0xa0c   :  { %2063 = vmatmul.mubr.msk.f32.vlgmr.msra.gmra.mrb[20].mxu1 %vm163_vm2, %v1591_v8 }
 0xa15   :  { %v2138_v7 = vpop.eup %2137 }
 0xa16   :  { %v1584_v9 = vsel %vm163_vm2, %v2138_v7, 0.0 }
 0xa17   :  { %1585 = vadd.xlane.f32.xlu0 %v1584_v9 }
 0xa2d   :  { %1672 = vrot.lane.b32.xlu0 %v2380_v13, %s2276_s1 }
 0xaa4   :  { %v1586_v12 = vpop.xlane.xlu0 %1585 }
 0xaa5   :  { %2139 = vrcp.f32 %v1586_v12 }
 0xaa8   :  { %v1673_v11 = vpop.permute.xlu0 %1672 }
 0xaa9   :  { %2066 = vmatpush3.msra.mxu0 %v1673_v11 }
 0xaaa   :  { %2070 = vmatprep.subr.mxu0 %v1749_v10 }
 0xaaf   :  { %v2140_v14 = vpop.eup %2139 }
 0xab0   :  { %v1592_v15 = vmul.f32 %v2140_v14, %v2138_v7 }
 0xab2   :  { %1595 = vst.msk [vmem:[#allocation9 + $0x38] sm:$0xff] %vm163_vm2, %v1592_v15  ;;  %2068 = vmatmul.mubr.msk.f32.vlgmr.msra.gmra.mrb[12].mxu0 %vm163_vm2, %v1592_v15 }
 0xab3   :  { %2071 = vmatpush3.msra.mxu0 %v1749_v10 }
 0xadf   :  { %v1668_v16 = vpop.f32.mrb[20].mxu1 }
 0xae0   :  { %v2064_v17 = vpop.f32.mrb[21].mxu1  ;;  %2072 = vmatprep.mubr.msk.f32.mxu0 %vm163_vm2, %v1668_v16 }
 0xb85   :  { %v1744_v18 = vpop.f32.mrb[12].mxu0 }
 0xb86   :  { %v2069_v19 = vpop.f32.mrb[13].mxu0  ;;  %2073 = vmatmul.mubr.msk.f32.vlgmr.msra.gmra.mrb[6].mxu0 %vm163_vm2, %v1744_v18 }
 0xb87   :  { %2218 = shalt.err (!%p2215_p0)
}
 0xb88   :  { %s2219_s27 = scalar_lea.hbm %s2554_s6, 1024 }
 0xb89   :  { %p2220_p1 = scmp.ne.s32.totalorder %s2554_s6, %s2219_s27  ;;  %p2223_p2 = scmp.lt.u32.totalorder %s2219_s27, %s2554_s6 }
 0xb8b   :  { %p2225_p3 = pnand %p2223_p2, %p2220_p1 }
 0xb8d   :  { %2228 = shalt.err (!%p2225_p3)
}
 0xb8e   :  { %1867 = dma.vmem_to_hbm [thread:$0]  %s1862_s22, 1024, %s2554_s6, [#allocation10], %s2261_s9, %s2261_s9, %s2262_s10  }
 0xb8f   :  { %v1913_v13 = vld [vmem:[%s2552_s4] ss:$0 sm:$0xff]  ;;  %s2278_s11 = smov [#allocation8]  }
 0xb90   :  { %s1849_s12 = sshll.u32 %s2278_s11, 4  ;;  %s1850_s12 = int_to_ptr.vmem [resolvable:$true] %s1849_s12 }
 0xb91   :  { %s2229_s2 = scalar_lea.vmem %s1850_s12, 256  ;;  %p2234_p5 = scmp.lt.s32.totalorder %s1850_s12, %s1850_s12 }
 0xb92   :  { %p2230_p4 = scmp.ne.s32.totalorder %s1850_s12, %s2229_s2  ;;  %p2235_p6 = scmp.lt.s32.totalorder %s2229_s2, %s2229_s2 }
 0xb94   :  { %p2236_p7 = por %p2235_p6, %p2234_p5 }
 0xb96   :  { %p2237_p8 = pnand %p2236_p7, %p2230_p4 }
 0xc59   :  { %v2074_v20 = vpop.f32.mrb[6].mxu0 }
 0xc5a   :  { %v1841_v21 = vadd.f32 %v2074_v20, %v1913_v13  ;;  %v1822_v22 = vpop.f32.mrb[7].mxu0 }
 0xc5b   :  { %v1840_v23 = vadd.f32 %v1913_v13, %v1822_v22 }
 0xc5c   :  { %1843 = vst.msk [vmem:[#allocation8 + $0x8] sm:$0xff] %vm78_vm0, %v1841_v21 }
 0xc5d   :  { %1842 = vst.msk [vmem:[#allocation8] sm:$0xff] %vm78_vm0, %v1840_v23 }
 0xc5e   :  { %2240 = shalt.err (!%p2237_p8)
}
 0xc5f   :  { %s2241_s13 = scalar_lea.hbm %s2553_s5, 256 }
 0xc60   :  { %p2242_p9 = scmp.ne.s32.totalorder %s2553_s5, %s2241_s13  ;;  %p2245_p10 = scmp.lt.u32.totalorder %s2241_s13, %s2553_s5 }
 0xc62   :  { %p2247_p11 = pnand %p2245_p10, %p2242_p9 }
 0xc64   :  { %2250 = shalt.err (!%p2247_p11)
}
 0xc65   :  { %1855 = dma.vmem_to_hbm [thread:$0]  %s1850_s12, 256, %s2553_s5, [#allocation4], %s2261_s9, %s2261_s9, %s2262_s10  }
 0xc66   :  { %2255 = dma.done.wait [#allocation4], 256  }
 0xc67   :  { %2256 = vsyncadd [#allocation4], 4294967040 }
 0xc68   :  { %2257 = dma.done.wait [#allocation10], 1024  }
 0xc69   :  { %2258 = vsyncadd [#allocation10], 4294966272 }
 0xc6a   :  { %1874 = vsyncpa [#allocation3], 1 }
 0xc6b   :  { %1875 = vsyncpa [#allocation6], 1 }
 0xc6c   :  { %1876 = vsyncpa [#allocation4], 1 }
 0xc6d   :  { %1877 = vsyncpa [#allocation10], 1 }

</bundles_post_ra>
